<compile_context>
chip_gen: v7x
topology: tpu7x:2x2x1
jax: 0.10.0
libtpu: 0.0.40
codegen_flags: <defaults>
</compile_context>

<pallas_src>
import functools

import jax
import jax.numpy as jnp
from jax.experimental import pallas as pl
from jax.experimental.pallas import tpu as pltpu

EPS = 1e-8
BIAS_NORM_PARAM = 1e-6


# --------------------------------------------------------------------------- #
# Kernel
# --------------------------------------------------------------------------- #
def _veclinear_kernel(v_ref, ww_ref, wa_ref, wb_ref, wlin_t_ref,
                      bias_f_ref, nbw_sum_ref, *out_refs, hidden, fused_out):
    H = hidden
    f32 = jnp.float32

    x = v_ref[...]                               # (T, 3H) in the streaming dtype
    mm_dtype = x.dtype                           # matmul operand dtype (f32 or bf16)

    # Per-component views of the packed lanes (static slices).
    v0 = x[:, 0 * H:1 * H]
    v1 = x[:, 1 * H:2 * H]
    v2 = x[:, 2 * H:3 * H]

    ww = ww_ref[...].astype(f32)                 # (3, H)
    w0, w1, w2 = ww[0:1, :], ww[1:2, :], ww[2:3, :]   # (1, H) -> implicit sublane bcast

    v0f, v1f, v2f = v0.astype(f32), v1.astype(f32), v2.astype(f32)

    # cross(v, w) along the component axis -- pure VPU work, kept in f32.
    cross = (v1f * w2 - v2f * w1,
             v2f * w0 - v0f * w2,
             v0f * w1 - v1f * w0)
    vcomp = (v0, v1, v2)

    wa = wa_ref[...]                             # (H, H)  = Ww^T @ W2a   (stream dtype)
    wb = wb_ref[...]                             # (H, H)  = W1^T @ W2b   (stream dtype)
    bias_f = bias_f_ref[...].astype(f32)         # (3, H)  fused per-component bias (f32)

    if fused_out:
        o_ref = out_refs[0]                      # (T, 4H): [vout_c0 | vout_c1 | vout_c2 | s]
        s_ref = None
    else:
        o_ref, s_ref = out_refs                  # (T, 3H), (T, H)

    # v_out_c = cross_c @ Wa + v_c @ Wb + fused_bias_c  (linear_2 folded in wrapper).
    # Per-component dots, stored directly into column slices -> no concat copies.
    for c in range(3):
        y = (jnp.dot(cross[c].astype(mm_dtype), wa, preferred_element_type=f32)
             + jnp.dot(vcomp[c], wb, preferred_element_type=f32)
             + bias_f[c:c + 1, :])
        o_ref[:, c * H:(c + 1) * H] = y.astype(o_ref.dtype)

    # s = sum_c LBS_w(v_c) == (v0+v1+v2) @ Ww^T + sum_c nb_w[c]   -> single matmul
    s = (jnp.dot((v0f + v1f + v2f).astype(mm_dtype), wlin_t_ref[...],
                 preferred_element_type=f32)
         + nbw_sum_ref[...].astype(f32))
    if fused_out:
        o_ref[:, 3 * H:4 * H] = s.astype(o_ref.dtype)
    else:
        s_ref[...] = s.astype(s_ref.dtype)


# --------------------------------------------------------------------------- #
# Wrapper helpers
# --------------------------------------------------------------------------- #
def _round_up(x, m):
    return ((x + m - 1) // m) * m


def _normed_bias_t(b):
    """b: (out, 3) -> (3, out), rows normalized as in LinearBiasSmall."""
    ss = jnp.sum(b * b, axis=1)
    n = jnp.sqrt(ss + EPS)
    n = jnp.where(n < BIAS_NORM_PARAM, BIAS_NORM_PARAM, n)
    return (b / n[:, None]).T


def _vmem_budget_bytes():
    """Generation-aware scoped-VMEM budget with headroom for Mosaic scratch."""
    phys = None
    try:
        info = pltpu.get_tpu_info()
        phys = getattr(info, "vmem_capacity_bytes", None)
    except Exception:
        phys = None
    if not phys:
        phys = 64 * 1024 * 1024        # conservative: v7x per-TensorCore VMEM
    # ~3/4 of physical, never above 96 MiB:
    #   v7x (64 MiB)  -> 48 MiB   (headroom for internal scratch / semaphores)
    #   v5e/v6e (128) -> 96 MiB   (maximize tiles on the low-BW parts)
    return min((int(phys) * 3) // 4, 96 * 1024 * 1024)


def _pick_tile_n(N, H, in_bytes, vmem_budget):
    """Largest row tile whose pipelined working set fits the VMEM budget."""
    # Resident constant operands (assume worst-case double buffering).
    const_bytes = 2 * (3 * H * H * in_bytes + 8 * H * 4)
    avail = max(vmem_budget - const_bytes - (2 << 20), 2 << 20)
    # Per-row streaming footprint: double-buffered (T,3H) input, double-buffered
    # (T,4H) f32 output block(s), plus ~8H f32 of live intermediates.
    per_row = 2 * 3 * H * in_bytes + 2 * 4 * H * 4 + 8 * H * 4
    t = int(avail // per_row)
    t = min(t, 8192)                   # step overhead (~0.35us) fully amortized here
    # Guarantee >= 2 grid steps so "parallel" can shard across v7x's two TensorCores.
    if N > 8:
        t = min(t, _round_up(pl.cdiv(N, 2), 8))
    t = max(8, (t // 8) * 8)
    return N if t >= N else t


def _build_call(N, H, T, grid, out_dtype, fused_out, vmem_budget, single_buffer_consts):
    kernel = functools.partial(_veclinear_kernel, hidden=H, fused_out=fused_out)

    # Constant operands: request single buffering (saves ~3*H^2 * bytes of VMEM).
    ckw = dict(pipeline_mode=pl.Buffered(1)) if single_buffer_consts else {}

    in_specs = [
        pl.BlockSpec((T, 3 * H), lambda i: (i, 0)),             # v (streamed)
        pl.BlockSpec((3, H), lambda i: (0, 0), **ckw),          # w_weight
        pl.BlockSpec((H, H), lambda i: (0, 0), **ckw),          # Wa = Ww^T @ W2a
        pl.BlockSpec((H, H), lambda i: (0, 0), **ckw),          # Wb = W1^T @ W2b
        pl.BlockSpec((H, H), lambda i: (0, 0), **ckw),          # Ww^T
        pl.BlockSpec((3, H), lambda i: (0, 0), **ckw),          # fused bias (f32)
        pl.BlockSpec((1, H), lambda i: (0, 0), **ckw),          # sum nb_w   (f32)
    ]

    if fused_out:
        # Lane-dense single output slab (T, 4H): v_out components + s.
        out_shape = jax.ShapeDtypeStruct((N, 4 * H), out_dtype)
        out_specs = pl.BlockSpec((T, 4 * H), lambda i: (i, 0))
    else:
        out_shape = (jax.ShapeDtypeStruct((N, 3 * H), out_dtype),
                     jax.ShapeDtypeStruct((N, H), out_dtype))
        out_specs = (pl.BlockSpec((T, 3 * H), lambda i: (i, 0)),
                     pl.BlockSpec((T, H), lambda i: (i, 0)))

    return pl.pallas_call(
        kernel,
        out_shape=out_shape,
        grid_spec=pltpu.PrefetchScalarGridSpec(
            num_scalar_prefetch=0,
            grid=grid,
            in_specs=in_specs,
            out_specs=out_specs,
        ),
        compiler_params=pltpu.CompilerParams(
            dimension_semantics=("parallel",),       # megacore-shardable (v7x: 2 TCs)
            vmem_limit_bytes=int(vmem_budget),
        ),
    )


def veclinear_forward(v, params, tile_n=None, stream_dtype=None):
    """v: (N, 3, H) float32 (PyTorch layout). Returns (v_out (N,3,H), s (N,H)).

    stream_dtype: optional dtype (e.g. jnp.bfloat16) for the streamed v tensor and
    the weight matrices; accumulation, cross product and biases stay in f32.
    """
    N, three, H = v.shape
    assert three == 3
    out_dtype = v.dtype
    mm_dtype = jnp.dtype(stream_dtype) if stream_dtype is not None else jnp.dtype(v.dtype)

    # ---- one-time parameter preprocessing (plain JAX, tiny) ----
    nb_w = _normed_bias_t(params["wlin_b"].astype(jnp.float32))     # (3, H)
    nb_1 = _normed_bias_t(params["l1_b"].astype(jnp.float32))       # (3, H)
    nb_2 = _normed_bias_t(params["l2_b"].astype(jnp.float32))       # (3, H)

    wlin_t = params["wlin_w"].astype(jnp.float32).T                 # (H, H)  x @ Ww^T
    l1_t = params["l1_w"].astype(jnp.float32).T                     # (H, H)
    l2_t = params["l2_w"].astype(jnp.float32).T                     # (2H, H)
    w2a, w2b = l2_t[:H], l2_t[H:]                                   # (H, H) each

    # fold linear_2 into the preceding linears
    wa = wlin_t @ w2a                                               # (H, H)
    wb = l1_t @ w2b                                                 # (H, H)
    bias_fused = (nb_w @ w2a + nb_1 @ w2b + nb_2).astype(jnp.float32)   # (3, H)
    nbw_sum = jnp.sum(nb_w, axis=0, keepdims=True).astype(jnp.float32)  # (1, H)
    ww = params["w_weight"].reshape(3, H)

    # Streamed / matmul operands in the streaming dtype (bf16 halves HBM bytes).
    v2d = v.reshape(N, 3 * H).astype(mm_dtype)      # free view reshape + optional cast
    ww_s = ww.astype(mm_dtype)
    wa_s = wa.astype(mm_dtype)
    wb_s = wb.astype(mm_dtype)
    wlin_s = wlin_t.astype(mm_dtype)

    vmem_budget = _vmem_budget_bytes()
    in_bytes = jnp.dtype(mm_dtype).itemsize
    if tile_n is None:
        T = _pick_tile_n(N, H, in_bytes, vmem_budget)
    else:
        # Guard the public tile_n against the (8,128) sublane constraint.
        T = min(N, _round_up(int(tile_n), 8))
    grid = (pl.cdiv(N, T),)

    fused_out = (H % 128) != 0      # fuse s into the v_out slab for lane-dense stores
    args = (v2d, ww_s, wa_s, wb_s, wlin_s, bias_fused, nbw_sum)

    def run(single_buffer_consts):
        call = _build_call(N, H, T, grid, out_dtype, fused_out, vmem_budget,
                           single_buffer_consts)
        return call(*args)

    try:
        res = run(True)
    except Exception:
        # pipeline_mode=pl.Buffered(1) not supported by this jax build -> default
        # double buffering of the constant operands (functionally identical).
        res = run(False)

    if fused_out:
        vout2d, s = res[:, :3 * H], res[:, 3 * H:]
    else:
        vout2d, s = res

    return vout2d.reshape(N, 3, H), s


# ---------------- pure-JAX reference (mirrors the PyTorch code) ---------------- #
def _linear_bias_small_ref(x, w, b):
    ss = jnp.sum(b ** 2, axis=1)
    norm = jnp.sqrt(ss + EPS)
    norm = jnp.where(norm < BIAS_NORM_PARAM, BIAS_NORM_PARAM, norm)
    nb = b / norm[:, None]                        # (out, 3)
    return jnp.matmul(x, w.T) + jnp.transpose(nb)[None]   # (N, 3, out)


def _veclinear_ref(v, params):
    ww = params["w_weight"]                       # (1, 3, H)
    cross = jnp.cross(v, jnp.broadcast_to(ww, v.shape), axis=1)
    vout_1 = _linear_bias_small_ref(cross, params["wlin_w"], params["wlin_b"])
    s = _linear_bias_small_ref(v, params["wlin_w"], params["wlin_b"]).sum(axis=1)
    vout_2 = _linear_bias_small_ref(v, params["l1_w"], params["l1_b"])
    v_out = _linear_bias_small_ref(jnp.concatenate([vout_1, vout_2], axis=2),
                                   params["l2_w"], params["l2_b"])
    return v_out, s


def _xavier_uniform(key, out_c, in_c):
    bound = (6.0 / (in_c + out_c)) ** 0.5
    return jax.random.uniform(key, (out_c, in_c), jnp.float32, -bound, bound)


def make_params(key, hidden):
    ks = jax.random.split(key, 8)
    return {
        # WOperator
        "w_weight": jax.random.normal(ks[0], (1, 3, hidden), jnp.float32),
        "wlin_w": _xavier_uniform(ks[1], hidden, hidden),
        "wlin_b": jax.random.normal(ks[2], (hidden, 3), jnp.float32),
        # linear_1
        "l1_w": _xavier_uniform(ks[3], hidden, hidden),
        "l1_b": jax.random.normal(ks[4], (hidden, 3), jnp.float32),
        # linear_2
        "l2_w": _xavier_uniform(ks[5], hidden, 2 * hidden),
        "l2_b": jax.random.normal(ks[6], (hidden, 3), jnp.float32),
    }


def _check(N, H, tile_n=None, seed=0, stream_dtype=None, atol=1e-4, rtol=1e-4):
    key = jax.random.PRNGKey(seed)
    k_v, k_p = jax.random.split(key)
    v = jax.random.normal(k_v, (N, 3, H), jnp.float32)
    params = make_params(k_p, H)

    v_out, s = jax.block_until_ready(
        veclinear_forward(v, params, tile_n=tile_n, stream_dtype=stream_dtype))
    v_out_ref, s_ref = _veclinear_ref(v, params)

    assert v_out.shape == (N, 3, H) and s.shape == (N, H)
    assert jnp.allclose(v_out, v_out_ref, atol=atol, rtol=rtol), "v_out mismatch"
    assert jnp.allclose(s, s_ref, atol=atol, rtol=rtol), "s mismatch"


if __name__ == "__main__":
    # small single-tile case; fused lane-dense (T, 4H=128) output path
    _check(N=2, H=32)
    # multi-tile pipelined path (3 tiles of 8 rows), explicit (guarded) tile_n
    _check(N=24, H=32, tile_n=8, seed=1)
    # H % 128 == 0 -> separate lane-dense outputs + auto >=2 grid steps (megacore)
    _check(N=24, H=128, seed=2)
    # bf16-streaming path (halves HBM bytes); validated at bf16-appropriate tolerance
    _check(N=24, H=32, seed=3, stream_dtype=jnp.bfloat16, atol=1e-1, rtol=1e-1)
    print("KERNEL_OK")
</pallas_src>

<mosaic_0001>
module attributes {stable_mosaic.version = 11 : i64} {
  func.func @_veclinear_kernel(%arg0: i32, %arg1: memref<2x96xf32, #tpu.memory_space<vmem>>, %arg2: memref<3x32xf32, #tpu.memory_space<vmem>>, %arg3: memref<32x32xf32, #tpu.memory_space<vmem>>, %arg4: memref<32x32xf32, #tpu.memory_space<vmem>>, %arg5: memref<32x32xf32, #tpu.memory_space<vmem>>, %arg6: memref<3x32xf32, #tpu.memory_space<vmem>>, %arg7: memref<1x32xf32, #tpu.memory_space<vmem>>, %arg8: memref<2x128xf32, #tpu.memory_space<vmem>>) attributes {dimension_semantics = [#tpu.dimension_semantics<parallel>], iteration_bounds = array<i64: 1>, scalar_prefetch = 0 : i64, scratch_operands = 0 : i64, tpu.core_type = #tpu.core_type<tc>, window_params = [{transform_indices = @transform_0, window_bounds = array<i64: 2, 96>}, {pipeline_mode = #tpu.pipeline_mode<synchronous>, transform_indices = @transform_1, window_bounds = array<i64: 3, 32>}, {pipeline_mode = #tpu.pipeline_mode<synchronous>, transform_indices = @transform_2, window_bounds = array<i64: 32, 32>}, {pipeline_mode = #tpu.pipeline_mode<synchronous>, transform_indices = @transform_3, window_bounds = array<i64: 32, 32>}, {pipeline_mode = #tpu.pipeline_mode<synchronous>, transform_indices = @transform_4, window_bounds = array<i64: 32, 32>}, {pipeline_mode = #tpu.pipeline_mode<synchronous>, transform_indices = @transform_5, window_bounds = array<i64: 3, 32>}, {pipeline_mode = #tpu.pipeline_mode<synchronous>, transform_indices = @transform_6, window_bounds = array<i64: 1, 32>}, {transform_indices = @transform_7, window_bounds = array<i64: 2, 128>}]} {
    %c0 = arith.constant 0 : index
    %c0_0 = arith.constant 0 : index
    %0 = vector.load %arg1[%c0, %c0_0] : memref<2x96xf32, #tpu.memory_space<vmem>>, vector<2x96xf32>
    %1 = vector.extract_strided_slice %0 {offsets = [0, 0], sizes = [2, 32], strides = [1, 1]} : vector<2x96xf32> to vector<2x32xf32>
    %2 = vector.extract_strided_slice %0 {offsets = [0, 32], sizes = [2, 32], strides = [1, 1]} : vector<2x96xf32> to vector<2x32xf32>
    %3 = vector.extract_strided_slice %0 {offsets = [0, 64], sizes = [2, 32], strides = [1, 1]} : vector<2x96xf32> to vector<2x32xf32>
    %c0_1 = arith.constant 0 : index
    %c0_2 = arith.constant 0 : index
    %4 = vector.load %arg2[%c0_1, %c0_2] : memref<3x32xf32, #tpu.memory_space<vmem>>, vector<3x32xf32>
    %5 = vector.extract_strided_slice %4 {offsets = [0, 0], sizes = [1, 32], strides = [1, 1]} : vector<3x32xf32> to vector<1x32xf32>
    %6 = vector.extract_strided_slice %4 {offsets = [1, 0], sizes = [1, 32], strides = [1, 1]} : vector<3x32xf32> to vector<1x32xf32>
    %7 = vector.extract_strided_slice %4 {offsets = [2, 0], sizes = [1, 32], strides = [1, 1]} : vector<3x32xf32> to vector<1x32xf32>
    %8 = vector.broadcast %7 : vector<1x32xf32> to vector<2x32xf32>
    %9 = arith.mulf %2, %8 : vector<2x32xf32>
    %10 = vector.broadcast %6 : vector<1x32xf32> to vector<2x32xf32>
    %11 = arith.mulf %3, %10 : vector<2x32xf32>
    %12 = arith.subf %9, %11 : vector<2x32xf32>
    %13 = vector.broadcast %5 : vector<1x32xf32> to vector<2x32xf32>
    %14 = arith.mulf %3, %13 : vector<2x32xf32>
    %15 = vector.broadcast %7 : vector<1x32xf32> to vector<2x32xf32>
    %16 = arith.mulf %1, %15 : vector<2x32xf32>
    %17 = arith.subf %14, %16 : vector<2x32xf32>
    %18 = vector.broadcast %6 : vector<1x32xf32> to vector<2x32xf32>
    %19 = arith.mulf %1, %18 : vector<2x32xf32>
    %20 = vector.broadcast %5 : vector<1x32xf32> to vector<2x32xf32>
    %21 = arith.mulf %2, %20 : vector<2x32xf32>
    %22 = arith.subf %19, %21 : vector<2x32xf32>
    %c0_3 = arith.constant 0 : index
    %c0_4 = arith.constant 0 : index
    %23 = vector.load %arg3[%c0_3, %c0_4] : memref<32x32xf32, #tpu.memory_space<vmem>>, vector<32x32xf32>
    %c0_5 = arith.constant 0 : index
    %c0_6 = arith.constant 0 : index
    %24 = vector.load %arg4[%c0_5, %c0_6] : memref<32x32xf32, #tpu.memory_space<vmem>>, vector<32x32xf32>
    %c0_7 = arith.constant 0 : index
    %c0_8 = arith.constant 0 : index
    %25 = vector.load %arg6[%c0_7, %c0_8] : memref<3x32xf32, #tpu.memory_space<vmem>>, vector<3x32xf32>
    %cst = arith.constant dense<0.000000e+00> : vector<2x32xf32>
    %26 = tpu.matmul %12, %23, %cst {dimension_numbers = #tpu.dot_dimension_numbers<[1], [0], [0], [1], [0, 0, 1, 1], [], []>} : vector<2x32xf32>, vector<32x32xf32>, vector<2x32xf32> -> vector<2x32xf32>
    %cst_9 = arith.constant dense<0.000000e+00> : vector<2x32xf32>
    %27 = tpu.matmul %1, %24, %cst_9 {dimension_numbers = #tpu.dot_dimension_numbers<[1], [0], [0], [1], [0, 0, 1, 1], [], []>} : vector<2x32xf32>, vector<32x32xf32>, vector<2x32xf32> -> vector<2x32xf32>
    %28 = arith.addf %26, %27 : vector<2x32xf32>
    %29 = vector.extract_strided_slice %25 {offsets = [0, 0], sizes = [1, 32], strides = [1, 1]} : vector<3x32xf32> to vector<1x32xf32>
    %30 = vector.broadcast %29 : vector<1x32xf32> to vector<2x32xf32>
    %31 = arith.addf %28, %30 : vector<2x32xf32>
    %c0_10 = arith.constant 0 : index
    %c0_11 = arith.constant 0 : index
    %32 = vector.load %arg8[%c0_10, %c0_11] : memref<2x128xf32, #tpu.memory_space<vmem>>, vector<2x32xf32>
    tpu.vector_store %arg8[%c0_10, %c0_11], %31 {strides = array<i32>} : memref<2x128xf32, #tpu.memory_space<vmem>>, vector<2x32xf32>,
    %cst_12 = arith.constant dense<0.000000e+00> : vector<2x32xf32>
    %33 = tpu.matmul %17, %23, %cst_12 {dimension_numbers = #tpu.dot_dimension_numbers<[1], [0], [0], [1], [0, 0, 1, 1], [], []>} : vector<2x32xf32>, vector<32x32xf32>, vector<2x32xf32> -> vector<2x32xf32>
    %cst_13 = arith.constant dense<0.000000e+00> : vector<2x32xf32>
    %34 = tpu.matmul %2, %24, %cst_13 {dimension_numbers = #tpu.dot_dimension_numbers<[1], [0], [0], [1], [0, 0, 1, 1], [], []>} : vector<2x32xf32>, vector<32x32xf32>, vector<2x32xf32> -> vector<2x32xf32>
    %35 = arith.addf %33, %34 : vector<2x32xf32>
    %36 = vector.extract_strided_slice %25 {offsets = [1, 0], sizes = [1, 32], strides = [1, 1]} : vector<3x32xf32> to vector<1x32xf32>
    %37 = vector.broadcast %36 : vector<1x32xf32> to vector<2x32xf32>
    %38 = arith.addf %35, %37 : vector<2x32xf32>
    %c0_14 = arith.constant 0 : index
    %c32 = arith.constant 32 : index
    %39 = vector.load %arg8[%c0_14, %c32] : memref<2x128xf32, #tpu.memory_space<vmem>>, vector<2x32xf32>
    tpu.vector_store %arg8[%c0_14, %c32], %38 {strides = array<i32>} : memref<2x128xf32, #tpu.memory_space<vmem>>, vector<2x32xf32>,
    %cst_15 = arith.constant dense<0.000000e+00> : vector<2x32xf32>
    %40 = tpu.matmul %22, %23, %cst_15 {dimension_numbers = #tpu.dot_dimension_numbers<[1], [0], [0], [1], [0, 0, 1, 1], [], []>} : vector<2x32xf32>, vector<32x32xf32>, vector<2x32xf32> -> vector<2x32xf32>
    %cst_16 = arith.constant dense<0.000000e+00> : vector<2x32xf32>
    %41 = tpu.matmul %3, %24, %cst_16 {dimension_numbers = #tpu.dot_dimension_numbers<[1], [0], [0], [1], [0, 0, 1, 1], [], []>} : vector<2x32xf32>, vector<32x32xf32>, vector<2x32xf32> -> vector<2x32xf32>
    %42 = arith.addf %40, %41 : vector<2x32xf32>
    %43 = vector.extract_strided_slice %25 {offsets = [2, 0], sizes = [1, 32], strides = [1, 1]} : vector<3x32xf32> to vector<1x32xf32>
    %44 = vector.broadcast %43 : vector<1x32xf32> to vector<2x32xf32>
    %45 = arith.addf %42, %44 : vector<2x32xf32>
    %c0_17 = arith.constant 0 : index
    %c64 = arith.constant 64 : index
    %46 = vector.load %arg8[%c0_17, %c64] : memref<2x128xf32, #tpu.memory_space<vmem>>, vector<2x32xf32>
    tpu.vector_store %arg8[%c0_17, %c64], %45 {strides = array<i32>} : memref<2x128xf32, #tpu.memory_space<vmem>>, vector<2x32xf32>,
    %47 = arith.addf %1, %2 : vector<2x32xf32>
    %48 = arith.addf %47, %3 : vector<2x32xf32>
    %c0_18 = arith.constant 0 : index
    %c0_19 = arith.constant 0 : index
    %49 = vector.load %arg5[%c0_18, %c0_19] : memref<32x32xf32, #tpu.memory_space<vmem>>, vector<32x32xf32>
    %cst_20 = arith.constant dense<0.000000e+00> : vector<2x32xf32>
    %50 = tpu.matmul %48, %49, %cst_20 {dimension_numbers = #tpu.dot_dimension_numbers<[1], [0], [0], [1], [0, 0, 1, 1], [], []>} : vector<2x32xf32>, vector<32x32xf32>, vector<2x32xf32> -> vector<2x32xf32>
    %c0_21 = arith.constant 0 : index
    %c0_22 = arith.constant 0 : index
    %51 = vector.load %arg7[%c0_21, %c0_22] : memref<1x32xf32, #tpu.memory_space<vmem>>, vector<1x32xf32>
    %52 = vector.broadcast %51 : vector<1x32xf32> to vector<2x32xf32>
    %53 = arith.addf %50, %52 : vector<2x32xf32>
    %c0_23 = arith.constant 0 : index
    %c96 = arith.constant 96 : index
    %54 = vector.load %arg8[%c0_23, %c96] : memref<2x128xf32, #tpu.memory_space<vmem>>, vector<2x32xf32>
    tpu.vector_store %arg8[%c0_23, %c96], %53 {strides = array<i32>} : memref<2x128xf32, #tpu.memory_space<vmem>>, vector<2x32xf32>,
    return
  }
  func.func @transform_0(%arg0: i32) -> (i32, i32) {
    %c0_i32 = arith.constant 0 : i32
    %c0_i32_0 = arith.constant 0 : i32
    return %arg0, %c0_i32 : i32, i32
  }
  func.func @transform_1(%arg0: i32) -> (i32, i32) {
    %c0_i32 = arith.constant 0 : i32
    %c0_i32_0 = arith.constant 0 : i32
    %c0_i32_1 = arith.constant 0 : i32
    return %c0_i32, %c0_i32_0 : i32, i32
  }
  func.func @transform_2(%arg0: i32) -> (i32, i32) {
    %c0_i32 = arith.constant 0 : i32
    %c0_i32_0 = arith.constant 0 : i32
    %c0_i32_1 = arith.constant 0 : i32
    return %c0_i32, %c0_i32_0 : i32, i32
  }
  func.func @transform_3(%arg0: i32) -> (i32, i32) {
    %c0_i32 = arith.constant 0 : i32
    %c0_i32_0 = arith.constant 0 : i32
    %c0_i32_1 = arith.constant 0 : i32
    return %c0_i32, %c0_i32_0 : i32, i32
  }
  func.func @transform_4(%arg0: i32) -> (i32, i32) {
    %c0_i32 = arith.constant 0 : i32
    %c0_i32_0 = arith.constant 0 : i32
    %c0_i32_1 = arith.constant 0 : i32
    return %c0_i32, %c0_i32_0 : i32, i32
  }
  func.func @transform_5(%arg0: i32) -> (i32, i32) {
    %c0_i32 = arith.constant 0 : i32
    %c0_i32_0 = arith.constant 0 : i32
    %c0_i32_1 = arith.constant 0 : i32
    return %c0_i32, %c0_i32_0 : i32, i32
  }
  func.func @transform_6(%arg0: i32) -> (i32, i32) {
    %c0_i32 = arith.constant 0 : i32
    %c0_i32_0 = arith.constant 0 : i32
    %c0_i32_1 = arith.constant 0 : i32
    return %c0_i32, %c0_i32_0 : i32, i32
  }
  func.func @transform_7(%arg0: i32) -> (i32, i32) {
    %c0_i32 = arith.constant 0 : i32
    %c0_i32_0 = arith.constant 0 : i32
    return %arg0, %c0_i32 : i32, i32
  }
}

module attributes {stable_mosaic.version = 11 : i64} {
  func.func @_veclinear_kernel(%arg0: i32, %arg1: memref<2x96xf32, #tpu.memory_space<vmem>>, %arg2: memref<3x32xf32, #tpu.memory_space<vmem>>, %arg3: memref<32x32xf32, #tpu.memory_space<vmem>>, %arg4: memref<32x32xf32, #tpu.memory_space<vmem>>, %arg5: memref<32x32xf32, #tpu.memory_space<vmem>>, %arg6: memref<3x32xf32, #tpu.memory_space<vmem>>, %arg7: memref<1x32xf32, #tpu.memory_space<vmem>>, %arg8: memref<2x128xf32, #tpu.memory_space<vmem>>) attributes {dimension_semantics = [#tpu.dimension_semantics<parallel>], iteration_bounds = array<i64: 1>, scalar_prefetch = 0 : i64, scratch_operands = 0 : i64, tpu.core_type = #tpu.core_type<tc>, window_params = [{transform_indices = @transform_0, window_bounds = array<i64: 2, 96>}, {pipeline_mode = #tpu.pipeline_mode<synchronous>, transform_indices = @transform_1, window_bounds = array<i64: 3, 32>}, {pipeline_mode = #tpu.pipeline_mode<synchronous>, transform_indices = @transform_2, window_bounds = array<i64: 32, 32>}, {pipeline_mode = #tpu.pipeline_mode<synchronous>, transform_indices = @transform_3, window_bounds = array<i64: 32, 32>}, {pipeline_mode = #tpu.pipeline_mode<synchronous>, transform_indices = @transform_4, window_bounds = array<i64: 32, 32>}, {pipeline_mode = #tpu.pipeline_mode<synchronous>, transform_indices = @transform_5, window_bounds = array<i64: 3, 32>}, {pipeline_mode = #tpu.pipeline_mode<synchronous>, transform_indices = @transform_6, window_bounds = array<i64: 1, 32>}, {transform_indices = @transform_7, window_bounds = array<i64: 2, 128>}]} {
    %c0 = arith.constant 0 : index
    %c0_0 = arith.constant 0 : index
    %0 = vector.load %arg1[%c0, %c0_0] : memref<2x96xf32, #tpu.memory_space<vmem>>, vector<2x96xf32>
    %1 = vector.extract_strided_slice %0 {offsets = [0, 0], sizes = [2, 32], strides = [1, 1]} : vector<2x96xf32> to vector<2x32xf32>
    %2 = vector.extract_strided_slice %0 {offsets = [0, 32], sizes = [2, 32], strides = [1, 1]} : vector<2x96xf32> to vector<2x32xf32>
    %3 = vector.extract_strided_slice %0 {offsets = [0, 64], sizes = [2, 32], strides = [1, 1]} : vector<2x96xf32> to vector<2x32xf32>
    %c0_1 = arith.constant 0 : index
    %c0_2 = arith.constant 0 : index
    %4 = vector.load %arg2[%c0_1, %c0_2] : memref<3x32xf32, #tpu.memory_space<vmem>>, vector<3x32xf32>
    %5 = vector.extract_strided_slice %4 {offsets = [0, 0], sizes = [1, 32], strides = [1, 1]} : vector<3x32xf32> to vector<1x32xf32>
    %6 = vector.extract_strided_slice %4 {offsets = [1, 0], sizes = [1, 32], strides = [1, 1]} : vector<3x32xf32> to vector<1x32xf32>
    %7 = vector.extract_strided_slice %4 {offsets = [2, 0], sizes = [1, 32], strides = [1, 1]} : vector<3x32xf32> to vector<1x32xf32>
    %8 = vector.broadcast %7 : vector<1x32xf32> to vector<2x32xf32>
    %9 = arith.mulf %2, %8 : vector<2x32xf32>
    %10 = vector.broadcast %6 : vector<1x32xf32> to vector<2x32xf32>
    %11 = arith.mulf %3, %10 : vector<2x32xf32>
    %12 = arith.subf %9, %11 : vector<2x32xf32>
    %13 = vector.broadcast %5 : vector<1x32xf32> to vector<2x32xf32>
    %14 = arith.mulf %3, %13 : vector<2x32xf32>
    %15 = vector.broadcast %7 : vector<1x32xf32> to vector<2x32xf32>
    %16 = arith.mulf %1, %15 : vector<2x32xf32>
    %17 = arith.subf %14, %16 : vector<2x32xf32>
    %18 = vector.broadcast %6 : vector<1x32xf32> to vector<2x32xf32>
    %19 = arith.mulf %1, %18 : vector<2x32xf32>
    %20 = vector.broadcast %5 : vector<1x32xf32> to vector<2x32xf32>
    %21 = arith.mulf %2, %20 : vector<2x32xf32>
    %22 = arith.subf %19, %21 : vector<2x32xf32>
    %c0_3 = arith.constant 0 : index
    %c0_4 = arith.constant 0 : index
    %23 = vector.load %arg3[%c0_3, %c0_4] : memref<32x32xf32, #tpu.memory_space<vmem>>, vector<32x32xf32>
    %c0_5 = arith.constant 0 : index
    %c0_6 = arith.constant 0 : index
    %24 = vector.load %arg4[%c0_5, %c0_6] : memref<32x32xf32, #tpu.memory_space<vmem>>, vector<32x32xf32>
    %c0_7 = arith.constant 0 : index
    %c0_8 = arith.constant 0 : index
    %25 = vector.load %arg6[%c0_7, %c0_8] : memref<3x32xf32, #tpu.memory_space<vmem>>, vector<3x32xf32>
    %cst = arith.constant dense<0.000000e+00> : vector<2x32xf32>
    %26 = tpu.matmul %12, %23, %cst {dimension_numbers = #tpu.dot_dimension_numbers<[1], [0], [0], [1], [0, 0, 1, 1], [], []>} : vector<2x32xf32>, vector<32x32xf32>, vector<2x32xf32> -> vector<2x32xf32>
    %cst_9 = arith.constant dense<0.000000e+00> : vector<2x32xf32>
    %27 = tpu.matmul %1, %24, %cst_9 {dimension_numbers = #tpu.dot_dimension_numbers<[1], [0], [0], [1], [0, 0, 1, 1], [], []>} : vector<2x32xf32>, vector<32x32xf32>, vector<2x32xf32> -> vector<2x32xf32>
    %28 = arith.addf %26, %27 : vector<2x32xf32>
    %29 = vector.extract_strided_slice %25 {offsets = [0, 0], sizes = [1, 32], strides = [1, 1]} : vector<3x32xf32> to vector<1x32xf32>
    %30 = vector.broadcast %29 : vector<1x32xf32> to vector<2x32xf32>
    %31 = arith.addf %28, %30 : vector<2x32xf32>
    %c0_10 = arith.constant 0 : index
    %c0_11 = arith.constant 0 : index
    %32 = vector.load %arg8[%c0_10, %c0_11] : memref<2x128xf32, #tpu.memory_space<vmem>>, vector<2x32xf32>
    tpu.vector_store %arg8[%c0_10, %c0_11], %31 {strides = array<i32>} : memref<2x128xf32, #tpu.memory_space<vmem>>, vector<2x32xf32>,
    %cst_12 = arith.constant dense<0.000000e+00> : vector<2x32xf32>
    %33 = tpu.matmul %17, %23, %cst_12 {dimension_numbers = #tpu.dot_dimension_numbers<[1], [0], [0], [1], [0, 0, 1, 1], [], []>} : vector<2x32xf32>, vector<32x32xf32>, vector<2x32xf32> -> vector<2x32xf32>
    %cst_13 = arith.constant dense<0.000000e+00> : vector<2x32xf32>
    %34 = tpu.matmul %2, %24, %cst_13 {dimension_numbers = #tpu.dot_dimension_numbers<[1], [0], [0], [1], [0, 0, 1, 1], [], []>} : vector<2x32xf32>, vector<32x32xf32>, vector<2x32xf32> -> vector<2x32xf32>
    %35 = arith.addf %33, %34 : vector<2x32xf32>
    %36 = vector.extract_strided_slice %25 {offsets = [1, 0], sizes = [1, 32], strides = [1, 1]} : vector<3x32xf32> to vector<1x32xf32>
    %37 = vector.broadcast %36 : vector<1x32xf32> to vector<2x32xf32>
    %38 = arith.addf %35, %37 : vector<2x32xf32>
    %c0_14 = arith.constant 0 : index
    %c32 = arith.constant 32 : index
    %39 = vector.load %arg8[%c0_14, %c32] : memref<2x128xf32, #tpu.memory_space<vmem>>, vector<2x32xf32>
    tpu.vector_store %arg8[%c0_14, %c32], %38 {strides = array<i32>} : memref<2x128xf32, #tpu.memory_space<vmem>>, vector<2x32xf32>,
    %cst_15 = arith.constant dense<0.000000e+00> : vector<2x32xf32>
    %40 = tpu.matmul %22, %23, %cst_15 {dimension_numbers = #tpu.dot_dimension_numbers<[1], [0], [0], [1], [0, 0, 1, 1], [], []>} : vector<2x32xf32>, vector<32x32xf32>, vector<2x32xf32> -> vector<2x32xf32>
    %cst_16 = arith.constant dense<0.000000e+00> : vector<2x32xf32>
    %41 = tpu.matmul %3, %24, %cst_16 {dimension_numbers = #tpu.dot_dimension_numbers<[1], [0], [0], [1], [0, 0, 1, 1], [], []>} : vector<2x32xf32>, vector<32x32xf32>, vector<2x32xf32> -> vector<2x32xf32>
    %42 = arith.addf %40, %41 : vector<2x32xf32>
    %43 = vector.extract_strided_slice %25 {offsets = [2, 0], sizes = [1, 32], strides = [1, 1]} : vector<3x32xf32> to vector<1x32xf32>
    %44 = vector.broadcast %43 : vector<1x32xf32> to vector<2x32xf32>
    %45 = arith.addf %42, %44 : vector<2x32xf32>
    %c0_17 = arith.constant 0 : index
    %c64 = arith.constant 64 : index
    %46 = vector.load %arg8[%c0_17, %c64] : memref<2x128xf32, #tpu.memory_space<vmem>>, vector<2x32xf32>
    tpu.vector_store %arg8[%c0_17, %c64], %45 {strides = array<i32>} : memref<2x128xf32, #tpu.memory_space<vmem>>, vector<2x32xf32>,
    %47 = arith.addf %1, %2 : vector<2x32xf32>
    %48 = arith.addf %47, %3 : vector<2x32xf32>
    %c0_18 = arith.constant 0 : index
    %c0_19 = arith.constant 0 : index
    %49 = vector.load %arg5[%c0_18, %c0_19] : memref<32x32xf32, #tpu.memory_space<vmem>>, vector<32x32xf32>
    %cst_20 = arith.constant dense<0.000000e+00> : vector<2x32xf32>
    %50 = tpu.matmul %48, %49, %cst_20 {dimension_numbers = #tpu.dot_dimension_numbers<[1], [0], [0], [1], [0, 0, 1, 1], [], []>} : vector<2x32xf32>, vector<32x32xf32>, vector<2x32xf32> -> vector<2x32xf32>
    %c0_21 = arith.constant 0 : index
    %c0_22 = arith.constant 0 : index
    %51 = vector.load %arg7[%c0_21, %c0_22] : memref<1x32xf32, #tpu.memory_space<vmem>>, vector<1x32xf32>
    %52 = vector.broadcast %51 : vector<1x32xf32> to vector<2x32xf32>
    %53 = arith.addf %50, %52 : vector<2x32xf32>
    %c0_23 = arith.constant 0 : index
    %c96 = arith.constant 96 : index
    %54 = vector.load %arg8[%c0_23, %c96] : memref<2x128xf32, #tpu.memory_space<vmem>>, vector<2x32xf32>
    tpu.vector_store %arg8[%c0_23, %c96], %53 {strides = array<i32>} : memref<2x128xf32, #tpu.memory_space<vmem>>, vector<2x32xf32>,
    return
  }
  func.func @transform_0(%arg0: i32) -> (i32, i32) {
    %c0_i32 = arith.constant 0 : i32
    %c0_i32_0 = arith.constant 0 : i32
    return %arg0, %c0_i32 : i32, i32
  }
  func.func @transform_1(%arg0: i32) -> (i32, i32) {
    %c0_i32 = arith.constant 0 : i32
    %c0_i32_0 = arith.constant 0 : i32
    %c0_i32_1 = arith.constant 0 : i32
    return %c0_i32, %c0_i32_0 : i32, i32
  }
  func.func @transform_2(%arg0: i32) -> (i32, i32) {
    %c0_i32 = arith.constant 0 : i32
    %c0_i32_0 = arith.constant 0 : i32
    %c0_i32_1 = arith.constant 0 : i32
    return %c0_i32, %c0_i32_0 : i32, i32
  }
  func.func @transform_3(%arg0: i32) -> (i32, i32) {
    %c0_i32 = arith.constant 0 : i32
    %c0_i32_0 = arith.constant 0 : i32
    %c0_i32_1 = arith.constant 0 : i32
    return %c0_i32, %c0_i32_0 : i32, i32
  }
  func.func @transform_4(%arg0: i32) -> (i32, i32) {
    %c0_i32 = arith.constant 0 : i32
    %c0_i32_0 = arith.constant 0 : i32
    %c0_i32_1 = arith.constant 0 : i32
    return %c0_i32, %c0_i32_0 : i32, i32
  }
  func.func @transform_5(%arg0: i32) -> (i32, i32) {
    %c0_i32 = arith.constant 0 : i32
    %c0_i32_0 = arith.constant 0 : i32
    %c0_i32_1 = arith.constant 0 : i32
    return %c0_i32, %c0_i32_0 : i32, i32
  }
  func.func @transform_6(%arg0: i32) -> (i32, i32) {
    %c0_i32 = arith.constant 0 : i32
    %c0_i32_0 = arith.constant 0 : i32
    %c0_i32_1 = arith.constant 0 : i32
    return %c0_i32, %c0_i32_0 : i32, i32
  }
  func.func @transform_7(%arg0: i32) -> (i32, i32) {
    %c0_i32 = arith.constant 0 : i32
    %c0_i32_0 = arith.constant 0 : i32
    return %arg0, %c0_i32 : i32, i32
  }
}

</mosaic_0001>

<bundles_post_ra>
// kernel: tpu_custom_call.1
= control target key start
LH: loop header
LB: loop body
LE: loop exit
PB: predicated region body
PF: predicated region fallthrough
CT: control target
= control target key end

     0   :  { %12 = vsyncpa [#allocation3], 0  ;;  %s1284_s0 = inlined_call_operand.hbm [shape: f32[2,96], index: 0, kind: input, shape index: {}]   ;;  %s1285_s1 = inlined_call_operand.hbm [shape: f32[3,32], index: 1, kind: input, shape index: {}]   ;;  %s1286_s2 = inlined_call_operand.hbm [shape: f32[32,32], index: 2, kind: input, shape index: {}]   ;;  %s1287_s3 = inlined_call_operand.hbm [shape: f32[32,32], index: 3, kind: input, shape index: {}]   ;;  %s1288_s4 = inlined_call_operand.hbm [shape: f32[32,32], index: 4, kind: input, shape index: {}]   ;;  %s1289_s5 = inlined_call_operand.vmem [shape: f32[3,32], index: 5, kind: input, shape index: {}]   ;;  %s1290_s6 = inlined_call_operand.vmem [shape: f32[1,32], index: 6, kind: input, shape index: {}]   ;;  %s1291_s7 = inlined_call_operand.hbm [shape: f32[2,128], index: 7, kind: output, shape index: {}]  }
   0x1   :  { %13 = vsyncpa [#allocation6], 0 }
   0x2   :  { %14 = vsyncpa [#allocation9], 0 }
   0x3   :  { %15 = vsyncpa [#allocation4], 0  ;;  %s1051_s24 = smov [#allocation5]   ;;  %s911_s28 = scalar_lea.hbm %s1285_s1, 64 }
   0x4   :  { %s32_s25 = sshll.u32 %s1051_s24, 4  ;;  %p912_p0 = scmp.ne.s32.totalorder %s1285_s1, %s911_s28  ;;  %s33_s25 = int_to_ptr.vmem [resolvable:$true] %s32_s25 }
   0x5   :  { %p915_p1 = scmp.lt.u32.totalorder %s911_s28, %s1285_s1 }
   0x7   :  { %p917_p2 = pnand %p915_p1, %p912_p0 }
   0x9   :  { %920 = shalt.err (!%p917_p2)
}
   0xa   :  { %s921_s10 = scalar_lea.vmem %s33_s25, 64  ;;  %p926_p4 = scmp.lt.s32.totalorder %s33_s25, %s33_s25 }
   0xb   :  { %p922_p3 = scmp.ne.s32.totalorder %s33_s25, %s921_s10  ;;  %p927_p5 = scmp.lt.s32.totalorder %s921_s10, %s921_s10 }
   0xd   :  { %p928_p6 = por %p927_p5, %p926_p4 }
   0xf   :  { %p929_p7 = pnand %p928_p6, %p922_p3 }
  0x11   :  { %932 = shalt.err (!%p929_p7)
}
  0x12   :  { %35 = dma.hbm_to_vmem [thread:$0]  %s1285_s1, 64, %s33_s25, [#allocation6]  }
  0x13   :  { %s1052_s13 = smov [#allocation8]   ;;  %s1053_s15 = smov [#allocation2]  }
  0x14   :  { %s53_s14 = sshll.u32 %s1052_s13, 4  ;;  %s22_s16 = sshll.u32 %s1053_s15, 4  ;;  %s54_s14 = int_to_ptr.vmem [resolvable:$true] %s53_s14  ;;  %s23_s16 = int_to_ptr.vmem [resolvable:$true] %s22_s16 }
  0x15   :  { %s933_s19 = scalar_lea.hbm %s1287_s3, 512 }
  0x16   :  { %p934_p8 = scmp.ne.s32.totalorder %s1287_s3, %s933_s19  ;;  %p937_p9 = scmp.lt.u32.totalorder %s933_s19, %s1287_s3 }
  0x18   :  { %p939_p10 = pnand %p937_p9, %p934_p8 }
  0x1a   :  { %942 = shalt.err (!%p939_p10)
}
  0x1b   :  { %s943_s1 = scalar_lea.vmem %s54_s14, 512  ;;  %p948_p12 = scmp.lt.s32.totalorder %s54_s14, %s54_s14 }
  0x1c   :  { %p944_p11 = scmp.ne.s32.totalorder %s54_s14, %s943_s1  ;;  %p949_p13 = scmp.lt.s32.totalorder %s943_s1, %s943_s1 }
  0x1e   :  { %p950_p0 = por %p949_p13, %p948_p12 }
  0x20   :  { %p951_p1 = pnand %p950_p0, %p944_p11 }
  0x22   :  { %954 = shalt.err (!%p951_p1)
}
  0x23   :  { %s1054_s24 = smov 128   ;;  %s1055_s25 = smov 8  }
  0x24   :  { %59 = dma.hbm_to_vmem [thread:$0]  %s1287_s3, 512, %s54_s14, [#allocation9], %s1054_s24, %s1054_s24, %s1055_s25  }
  0x25   :  { %s955_s30 = scalar_lea.hbm %s1284_s0, 32 }
  0x26   :  { %p956_p2 = scmp.ne.s32.totalorder %s1284_s0, %s955_s30  ;;  %p959_p3 = scmp.lt.u32.totalorder %s955_s30, %s1284_s0 }
  0x28   :  { %p961_p4 = pnand %p959_p3, %p956_p2 }
  0x2a   :  { %964 = shalt.err (!%p961_p4)
}
  0x2b   :  { %s965_s12 = scalar_lea.vmem %s23_s16, 32  ;;  %p970_p6 = scmp.lt.s32.totalorder %s23_s16, %s23_s16 }
  0x2c   :  { %p966_p5 = scmp.ne.s32.totalorder %s23_s16, %s965_s12  ;;  %p971_p7 = scmp.lt.s32.totalorder %s965_s12, %s965_s12 }
  0x2e   :  { %p972_p8 = por %p971_p7, %p970_p6 }
  0x30   :  { %p973_p9 = pnand %p972_p8, %p966_p5 }
  0x32   :  { %976 = shalt.err (!%p973_p9)
}
  0x33   :  { %25 = dma.hbm_to_vmem [thread:$0]  %s1284_s0, 32, %s23_s16, [#allocation3]  }
  0x34   :  { %s1056_s14 = smov [#allocation7]   ;;  %s1057_s17 = smov [#allocation10]  }
  0x35   :  { %s41_s15 = sshll.u32 %s1056_s14, 4  ;;  %s65_s18 = sshll.u32 %s1057_s17, 4  ;;  %s42_s15 = int_to_ptr.vmem [resolvable:$true] %s41_s15  ;;  %s66_s18 = int_to_ptr.vmem [resolvable:$true] %s65_s18 }
  0x36   :  { %s977_s21 = scalar_lea.hbm %s1286_s2, 512 }
  0x37   :  { %p978_p10 = scmp.ne.s32.totalorder %s1286_s2, %s977_s21  ;;  %p981_p11 = scmp.lt.u32.totalorder %s977_s21, %s1286_s2 }
  0x39   :  { %p983_p12 = pnand %p981_p11, %p978_p10 }
  0x3b   :  { %986 = shalt.err (!%p983_p12)
}
  0x3c   :  { %s987_s0 = scalar_lea.vmem %s42_s15, 512  ;;  %p992_p0 = scmp.lt.s32.totalorder %s42_s15, %s42_s15 }
  0x3d   :  { %p988_p13 = scmp.ne.s32.totalorder %s42_s15, %s987_s0  ;;  %p993_p1 = scmp.lt.s32.totalorder %s987_s0, %s987_s0 }
  0x3f   :  { %p994_p2 = por %p993_p1, %p992_p0 }
  0x41   :  { %p995_p3 = pnand %p994_p2, %p988_p13 }
  0x43   :  { %998 = shalt.err (!%p995_p3)
}
  0x44   :  { %47 = dma.hbm_to_vmem [thread:$0]  %s1286_s2, 512, %s42_s15, [#allocation6], %s1054_s24, %s1054_s24, %s1055_s25  }
  0x45   :  { %s999_s30 = scalar_lea.hbm %s1288_s4, 512 }
  0x46   :  { %p1000_p4 = scmp.ne.s32.totalorder %s1288_s4, %s999_s30  ;;  %p1003_p5 = scmp.lt.u32.totalorder %s999_s30, %s1288_s4 }
  0x48   :  { %p1005_p6 = pnand %p1003_p5, %p1000_p4 }
  0x4a   :  { %1008 = shalt.err (!%p1005_p6)
}
  0x4b   :  { %s1009_s12 = scalar_lea.vmem %s66_s18, 512  ;;  %p1014_p8 = scmp.lt.s32.totalorder %s66_s18, %s66_s18 }
  0x4c   :  { %p1010_p7 = scmp.ne.s32.totalorder %s66_s18, %s1009_s12  ;;  %p1015_p9 = scmp.lt.s32.totalorder %s1009_s12, %s1009_s12 }
  0x4e   :  { %p1016_p10 = por %p1015_p9, %p1014_p8 }
  0x50   :  { %p1017_p11 = pnand %p1016_p10, %p1010_p7 }
  0x52   :  { %1020 = shalt.err (!%p1017_p11)
}
  0x53   :  { %71 = dma.hbm_to_vmem [thread:$0]  %s1288_s4, 512, %s66_s18, [#allocation9], %s1054_s24, %s1054_s24, %s1055_s25  }
  0x54   :  { %1043 = dma.done.wait [#allocation3], 32  }
  0x55   :  { %1044 = vsyncadd [#allocation3], 4294967264 }
  0x56   :  { %1045 = dma.done.wait [#allocation6], 576  }
  0x57   :  { %1046 = vsyncadd [#allocation6], 4294966720 }
  0x58   :  { %1047 = dma.done.wait [#allocation9], 1024  }
  0x59   :  { %1048 = vsyncadd [#allocation9], 4294966272  ;;  %v93_v0 = vlaneseq  ;;  %v92_v4 = vld [vmem:[#allocation5] sm:$0x7]  ;;  %s1058_s13 = smov 64   ;;  %s1059_s4 = smov 32  }
  0x5a   :  { %v1186_v7 = vld [vmem:[#allocation2] sm:$0x3]  ;;  %v145_v12 = vld [vmem:[#allocation8] sm:$0xff]  ;;  %v146_v13 = vld [vmem:[#allocation8 + $0x8] sm:$0xff]  ;;  %s1060_s24 = smov 96   ;;  %v1061_v16 = vmov 0.0|0.0  }
  0x5b   :  { %v1174_v1 = vshrl.u32 %v93_v0, 7  ;;  %v147_v14 = vld [vmem:[#allocation8 + $0x10] sm:$0xff]  ;;  %855 = vmatprep.subr.bf16.mxu0 %v1061_v16  ;;  %v856_v17 = vpack.c.bf16 %v146_v13, %v145_v12  ;;  %v148_v18 = vld [vmem:[#allocation8 + $0x18] sm:$0xff]  ;;  %v141_v19 = vld [vmem:[#allocation7] sm:$0xff]  ;;  %vm1062_vm0 = vmmov 0   ;;  %v1063_v21 = vmov 0.0   ;;  %861 = vmatprep.subr.bf16.mxu1 %v1061_v16 }
  0x5c   :  { %v142_v20 = vld [vmem:[#allocation7 + $0x8] sm:$0xff]  ;;  %786 = vmatprep.mubr.msk.f32.mxu0 %vm1062_vm0, %v1063_v21  ;;  %v859_v23 = vpack.c.bf16 %v148_v18, %v147_v14  ;;  %797 = vmatprep.mubr.msk.f32.mxu1 %vm1062_vm0, %v1063_v21  ;;  %v143_v24 = vld [vmem:[#allocation7 + $0x10] sm:$0xff]  ;;  %v144_v25 = vld [vmem:[#allocation7 + $0x18] sm:$0xff]  ;;  %vm150_vm1 = vcmask 261120   ;;  %vm304_vm2 = vcmask 254976   ;;  %vm464_vm3 = vcmask 517376  }
  0x5d   :  { %v104_v2 = vsub.s32 1, %v1174_v1  ;;  %v95_v3 = vsub.s32 2, %v1174_v1  ;;  %v118_v9 = vsub.s32 0, %v1174_v1  ;;  %v1200_v22 = vpack.c.bf16 %v142_v20, %v141_v19  ;;  %857 = vmatpush3.bf16.msra.mxu0 %v856_v17  ;;  %v628_v38 = vld [vmem:[#allocation10] sm:$0xff]  ;;  %v629_v39 = vld [vmem:[#allocation10 + $0x8] sm:$0xff]  ;;  %v630_v42 = vld [vmem:[#allocation10 + $0x10] sm:$0xff] }
  0x5e   :  { %858 = vmatprep.subr.bf16.mxu0 %v1061_v16  ;;  %v1208_v26 = vpack.c.bf16 %v144_v25, %v143_v24  ;;  %v892_v41 = vpack.c.bf16 %v629_v39, %v628_v38  ;;  %v631_v43 = vld [vmem:[#allocation10 + $0x18] sm:$0xff]  ;;  %v149_v60 = vld [vmem:[%s1289_s5] sm:$0x7]  ;;  %s1064_s5 = smov [#allocation11]   ;;  %vm622_vm4 = vcmask 779776   ;;  %vm716_vm5 = vcmask 1042176  }
  0x5f   :  { %v1180_v5 = vrot.slane %v92_v4, %v104_v2  ;;  %v96_v6 = vrot.slane %v92_v4, %v95_v3  ;;  %v119_v15 = vrot.slane %v92_v4, %v118_v9  ;;  %863 = vmatpush3.bf16.msra.mxu1 %v1200_v22  ;;  %v895_v45 = vpack.c.bf16 %v631_v43, %v630_v42  ;;  %s724_s18 = sshll.u32 %s1064_s5, 4  ;;  %s725_s18 = int_to_ptr.vmem [resolvable:$true] %s724_s18 }
  0x60   :  { %864 = vmatprep.subr.bf16.mxu1 %v1061_v16  ;;  %v302_v61 = vrot.slane %v149_v60, %v118_v9  ;;  %v616_v12 = vrot.slane %v149_v60, %v95_v3  ;;  %p1026_p13 = scmp.lt.s32.totalorder %s725_s18, %s725_s18 }
  0x61   :  { %107 = vrot.lane.b32.xlu0 %v1180_v5, %s1058_s13  ;;  %v125_v8 = vmul.f32 %v96_v6, %v1186_v7  ;;  %860 = vmatpush3.bf16.msra.mxu0 %v859_v23  ;;  %v131_v51 = vmul.f32 %v1180_v5, %v1186_v7  ;;  %v458_v5 = vrot.slane %v149_v60, %v104_v2 }
  0x62   :  { %867 = vmatprep.subr.bf16.mxu0 %v1061_v16 }
  0x63   :  { %866 = vmatpush3.bf16.msra.mxu1 %v1208_v26 }
  0x64   :  { %873 = vmatprep.subr.bf16.mxu1 %v1061_v16  ;;  %787 = vmatmul.mubr.msk.f32.vlgmr.msra.gmra.mrb[0].mxu0 %vm150_vm1, %v1186_v7 }
  0x65   :  { %98 = vrot.lane.b32.xlu0 %v96_v6, %s1059_s4  ;;  %869 = vmatpush3.bf16.msra.mxu0 %v856_v17 }
  0x66   :  { %808 = vmatprep.mubr.msk.f32.mxu0 %vm1062_vm0, %v1063_v21  ;;  %870 = vmatprep.subr.bf16.mxu0 %v1061_v16 }
  0x69   :  { %127 = vrot.lane.b32.xlu0 %v125_v8, %s1058_s13  ;;  %872 = vmatpush3.bf16.msra.mxu0 %v859_v23 }
  0x6a   :  { %879 = vmatprep.subr.bf16.mxu0 %v1061_v16 }
  0xd3   :  { %v108_v10 = vpop.permute.xlu0 %107 }
  0xd4   :  { %v110_v11 = vmul.f32 %v108_v10, %v1186_v7 }
  0xd6   :  { %112 = vrot.lane.b32.xlu1 %v110_v11, %s1060_s24  ;;  %v741_v11 = vld [vmem:[%s1290_s6] ss:$0 sm:$0xff]  ;;  %s1021_s6 = scalar_lea.vmem %s725_s18, 32 }
  0xd7   :  { %v99_v27 = vpop.permute.xlu0 %98  ;;  %p1022_p12 = scmp.ne.s32.totalorder %s725_s18, %s1021_s6  ;;  %p1027_p0 = scmp.lt.s32.totalorder %s1021_s6, %s1021_s6 }
  0xd8   :  { %v101_v28 = vmul.f32 %v99_v27, %v1186_v7 }
  0xd9   :  { %p1028_p1 = por %p1027_p0, %p1026_p13 }
  0xda   :  { %121 = vrot.lane.b32.xlu1 %v119_v15, %s1058_s13 }
  0xdb   :  { %v128_v32 = vpop.permute.xlu0 %127  ;;  %p1029_p2 = pnand %p1028_p1, %p1022_p12 }
  0xde   :  { %132 = vrot.lane.b32.xlu1 %v119_v15, %s1059_s4 }
  0xe2   :  { %306 = vrot.lane.b32.xlu1 %v1186_v7, %s1060_s24 }
  0xe6   :  { %466 = vrot.lane.b32.xlu1 %v1186_v7, %s1058_s13 }
 0x137   :  { %v220_v47 = vpop.f32.mrb[0].mxu0 }
 0x138   :  { %v788_v48 = vpop.f32.mrb[1].mxu0 }
 0x148   :  { %v113_v29 = vpop.permute.xlu1 %112 }
 0x149   :  { %v115_v30 = vsub.f32 %v101_v28, %v113_v29 }
 0x14b   :  { %225 = vrot.lane.b32.xlu0 %v115_v30, %s1060_s24 }
 0x14c   :  { %v122_v31 = vpop.permute.xlu1 %121 }
 0x14d   :  { %v124_v33 = vmul.f32 %v122_v31, %v1186_v7 }
 0x14f   :  { %v130_v34 = vsub.f32 %v124_v33, %v128_v32 }
 0x150   :  { %v133_v35 = vpop.permute.xlu1 %132 }
 0x151   :  { %381 = vrot.lane.b32.xlu0 %v130_v34, %s1058_s13  ;;  %v135_v36 = vmul.f32 %v133_v35, %v1186_v7 }
 0x154   :  { %v307_v37 = vpop.permute.xlu1 %306 }
 0x155   :  { %137 = vrot.lane.b32.xlu0 %v135_v36, %s1060_s24  ;;  %809 = vmatmul.mubr.msk.f32.vlgmr.msra.gmra.mrb[2].mxu0 %vm150_vm1, %v307_v37  ;;  %v625_v44 = vadd.f32 %v307_v37, %v1186_v7 }
 0x156   :  { %881 = vmatpush3.bf16.msra.mxu0 %v856_v17  ;;  %830 = vmatprep.mubr.msk.f32.mxu0 %vm1062_vm0, %v1063_v21 }
 0x157   :  { %882 = vmatprep.subr.bf16.mxu0 %v1061_v16 }
 0x158   :  { %v467_v40 = vpop.permute.xlu1 %466 }
 0x159   :  { %v627_v46 = vadd.f32 %v625_v44, %v467_v40 }
 0x15a   :  { %884 = vmatpush3.bf16.msra.mxu0 %v859_v23 }
 0x15b   :  { %891 = vmatprep.subr.bf16.mxu0 %v1061_v16 }
 0x15d   :  { %831 = vmatmul.mubr.msk.f32.vlgmr.msra.gmra.mrb[4].mxu0 %vm150_vm1, %v467_v40 }
 0x15e   :  { %893 = vmatpush3.bf16.msra.mxu0 %v892_v41  ;;  %852 = vmatprep.mubr.msk.f32.mxu0 %vm1062_vm0, %v1063_v21 }
 0x15f   :  { %894 = vmatprep.subr.bf16.mxu0 %v1061_v16 }
 0x162   :  { %896 = vmatpush3.bf16.msra.mxu0 %v895_v45 }
 0x165   :  { %853 = vmatmul.mubr.msk.f32.vlgmr.msra.gmra.mrb[6].mxu0 %vm150_vm1, %v627_v46 }
 0x1bd   :  { %v226_v49 = vpop.permute.xlu0 %225 }
 0x1be   :  { %798 = vmatmul.mubr.msk.f32.vlgmr.msra.gmra.mrb[0].mxu1 %vm150_vm1, %v226_v49 }
 0x1bf   :  { %875 = vmatpush3.bf16.msra.mxu1 %v1200_v22  ;;  %819 = vmatprep.mubr.msk.f32.mxu1 %vm1062_vm0, %v1063_v21 }
 0x1c0   :  { %876 = vmatprep.subr.bf16.mxu1 %v1061_v16 }
 0x1c3   :  { %878 = vmatpush3.bf16.msra.mxu1 %v1208_v26  ;;  %v382_v50 = vpop.permute.xlu0 %381 }
 0x1c4   :  { %885 = vmatprep.subr.bf16.mxu1 %v1061_v16 }
 0x1c6   :  { %820 = vmatmul.mubr.msk.f32.vlgmr.msra.gmra.mrb[2].mxu1 %vm150_vm1, %v382_v50 }
 0x1c7   :  { %887 = vmatpush3.bf16.msra.mxu1 %v1200_v22  ;;  %v138_v52 = vpop.permute.xlu0 %137  ;;  %841 = vmatprep.mubr.msk.f32.mxu1 %vm1062_vm0, %v1063_v21 }
 0x1c8   :  { %888 = vmatprep.subr.bf16.mxu1 %v1061_v16  ;;  %v140_v53 = vsub.f32 %v131_v51, %v138_v52 }
 0x1cb   :  { %890 = vmatpush3.bf16.msra.mxu1 %v1208_v26 }
 0x1ce   :  { %842 = vmatmul.mubr.msk.f32.vlgmr.msra.gmra.mrb[4].mxu1 %vm150_vm1, %v140_v53 }
 0x228   :  { %v376_v54 = vpop.f32.mrb[2].mxu0 }
 0x229   :  { %v810_v55 = vpop.f32.mrb[3].mxu0 }
 0x230   :  { %v536_v56 = vpop.f32.mrb[4].mxu0 }
 0x231   :  { %v832_v57 = vpop.f32.mrb[5].mxu0 }
 0x238   :  { %v708_v58 = vpop.f32.mrb[6].mxu0 }
 0x239   :  { %v854_v59 = vpop.f32.mrb[7].mxu0  ;;  %v709_v9 = vadd.f32 %v741_v11, %v708_v58 }
 0x291   :  { %v295_v62 = vpop.f32.mrb[0].mxu1 }
 0x292   :  { %v296_v63 = vadd.f32 %v295_v62, %v220_v47  ;;  %v799_v0 = vpop.f32.mrb[1].mxu1 }
 0x294   :  { %v303_v4 = vadd.f32 %v302_v61, %v296_v63 }
 0x296   :  { %305 = vst.msk [vmem:[#allocation11] sm:$0x3] %vm304_vm2, %v303_v4 }
 0x299   :  { %v451_v6 = vpop.f32.mrb[2].mxu1 }
 0x29a   :  { %v452_v7 = vadd.f32 %v451_v6, %v376_v54  ;;  %v821_v8 = vpop.f32.mrb[3].mxu1 }
 0x29c   :  { %v459_v10 = vadd.f32 %v458_v5, %v452_v7 }
 0x29e   :  { %461 = vrot.lane.b32.xlu1 %v459_v10, %s1059_s4 }
 0x2a1   :  { %v609_v13 = vpop.f32.mrb[4].mxu1 }
 0x2a2   :  { %v610_v14 = vadd.f32 %v609_v13, %v536_v56  ;;  %713 = vrot.lane.b32.xlu1 %v709_v9, %s1060_s24  ;;  %v843_v15 = vpop.f32.mrb[5].mxu1 }
 0x2a4   :  { %v617_v2 = vadd.f32 %v616_v12, %v610_v14 }
 0x2a6   :  { %619 = vrot.lane.b32.xlu0 %v617_v2, %s1058_s13 }
 0x310   :  { %v462_v16 = vpop.permute.xlu1 %461 }
 0x311   :  { %465 = vst.msk [vmem:[#allocation11] sm:$0x3] %vm464_vm3, %v462_v16 }
 0x314   :  { %v714_v18 = vpop.permute.xlu1 %713 }
 0x318   :  { %v620_v17 = vpop.permute.xlu0 %619 }
 0x319   :  { %623 = vst.msk [vmem:[#allocation11] sm:$0x3] %vm622_vm4, %v620_v17 }
 0x31a   :  { %717 = vst.msk [vmem:[#allocation11] sm:$0x3] %vm716_vm5, %v714_v18 }
 0x31b   :  { %1032 = shalt.err (!%p1029_p2)
}
 0x31c   :  { %s1033_s21 = scalar_lea.hbm %s1291_s7, 32 }
 0x31d   :  { %p1034_p3 = scmp.ne.s32.totalorder %s1291_s7, %s1033_s21  ;;  %p1037_p4 = scmp.lt.u32.totalorder %s1033_s21, %s1291_s7 }
 0x31f   :  { %p1039_p5 = pnand %p1037_p4, %p1034_p3 }
 0x321   :  { %1042 = shalt.err (!%p1039_p5)
}
 0x322   :  { %727 = dma.vmem_to_hbm [thread:$0]  %s725_s18, 32, %s1291_s7, [#allocation4]  }
 0x323   :  { %1049 = dma.done.wait [#allocation4], 32  }
 0x324   :  { %1050 = vsyncadd [#allocation4], 4294967264 }
 0x325   :  { %731 = vsyncpa [#allocation3], 1 }
 0x326   :  { %732 = vsyncpa [#allocation6], 1 }
 0x327   :  { %733 = vsyncpa [#allocation9], 1 }
 0x328   :  { %734 = vsyncpa [#allocation4], 1 }

// kernel: tpu_custom_call.1
= control target key start
LH: loop header
LB: loop body
LE: loop exit
PB: predicated region body
PF: predicated region fallthrough
CT: control target
= control target key end

     0   :  { %12 = vsyncpa [#allocation3], 0  ;;  %s1284_s0 = inlined_call_operand.hbm [shape: f32[2,96], index: 0, kind: input, shape index: {}]   ;;  %s1285_s1 = inlined_call_operand.hbm [shape: f32[3,32], index: 1, kind: input, shape index: {}]   ;;  %s1286_s2 = inlined_call_operand.hbm [shape: f32[32,32], index: 2, kind: input, shape index: {}]   ;;  %s1287_s3 = inlined_call_operand.hbm [shape: f32[32,32], index: 3, kind: input, shape index: {}]   ;;  %s1288_s4 = inlined_call_operand.hbm [shape: f32[32,32], index: 4, kind: input, shape index: {}]   ;;  %s1289_s5 = inlined_call_operand.vmem [shape: f32[3,32], index: 5, kind: input, shape index: {}]   ;;  %s1290_s6 = inlined_call_operand.vmem [shape: f32[1,32], index: 6, kind: input, shape index: {}]   ;;  %s1291_s7 = inlined_call_operand.hbm [shape: f32[2,128], index: 7, kind: output, shape index: {}]  }
   0x1   :  { %13 = vsyncpa [#allocation6], 0 }
   0x2   :  { %14 = vsyncpa [#allocation9], 0 }
   0x3   :  { %15 = vsyncpa [#allocation4], 0  ;;  %s1051_s24 = smov [#allocation5]   ;;  %s911_s28 = scalar_lea.hbm %s1285_s1, 64 }
   0x4   :  { %s32_s25 = sshll.u32 %s1051_s24, 4  ;;  %p912_p0 = scmp.ne.s32.totalorder %s1285_s1, %s911_s28  ;;  %s33_s25 = int_to_ptr.vmem [resolvable:$true] %s32_s25 }
   0x5   :  { %p915_p1 = scmp.lt.u32.totalorder %s911_s28, %s1285_s1 }
   0x7   :  { %p917_p2 = pnand %p915_p1, %p912_p0 }
   0x9   :  { %920 = shalt.err (!%p917_p2)
}
   0xa   :  { %s921_s10 = scalar_lea.vmem %s33_s25, 64  ;;  %p926_p4 = scmp.lt.s32.totalorder %s33_s25, %s33_s25 }
   0xb   :  { %p922_p3 = scmp.ne.s32.totalorder %s33_s25, %s921_s10  ;;  %p927_p5 = scmp.lt.s32.totalorder %s921_s10, %s921_s10 }
   0xd   :  { %p928_p6 = por %p927_p5, %p926_p4 }
   0xf   :  { %p929_p7 = pnand %p928_p6, %p922_p3 }
  0x11   :  { %932 = shalt.err (!%p929_p7)
}
  0x12   :  { %35 = dma.hbm_to_vmem [thread:$0]  %s1285_s1, 64, %s33_s25, [#allocation6]  }
  0x13   :  { %s1052_s13 = smov [#allocation8]   ;;  %s1053_s15 = smov [#allocation2]  }
  0x14   :  { %s53_s14 = sshll.u32 %s1052_s13, 4  ;;  %s22_s16 = sshll.u32 %s1053_s15, 4  ;;  %s54_s14 = int_to_ptr.vmem [resolvable:$true] %s53_s14  ;;  %s23_s16 = int_to_ptr.vmem [resolvable:$true] %s22_s16 }
  0x15   :  { %s933_s19 = scalar_lea.hbm %s1287_s3, 512 }
  0x16   :  { %p934_p8 = scmp.ne.s32.totalorder %s1287_s3, %s933_s19  ;;  %p937_p9 = scmp.lt.u32.totalorder %s933_s19, %s1287_s3 }
  0x18   :  { %p939_p10 = pnand %p937_p9, %p934_p8 }
  0x1a   :  { %942 = shalt.err (!%p939_p10)
}
  0x1b   :  { %s943_s1 = scalar_lea.vmem %s54_s14, 512  ;;  %p948_p12 = scmp.lt.s32.totalorder %s54_s14, %s54_s14 }
  0x1c   :  { %p944_p11 = scmp.ne.s32.totalorder %s54_s14, %s943_s1  ;;  %p949_p13 = scmp.lt.s32.totalorder %s943_s1, %s943_s1 }
  0x1e   :  { %p950_p0 = por %p949_p13, %p948_p12 }
  0x20   :  { %p951_p1 = pnand %p950_p0, %p944_p11 }
  0x22   :  { %954 = shalt.err (!%p951_p1)
}
  0x23   :  { %s1054_s24 = smov 128   ;;  %s1055_s25 = smov 8  }
  0x24   :  { %59 = dma.hbm_to_vmem [thread:$0]  %s1287_s3, 512, %s54_s14, [#allocation9], %s1054_s24, %s1054_s24, %s1055_s25  }
  0x25   :  { %s955_s30 = scalar_lea.hbm %s1284_s0, 32 }
  0x26   :  { %p956_p2 = scmp.ne.s32.totalorder %s1284_s0, %s955_s30  ;;  %p959_p3 = scmp.lt.u32.totalorder %s955_s30, %s1284_s0 }
  0x28   :  { %p961_p4 = pnand %p959_p3, %p956_p2 }
  0x2a   :  { %964 = shalt.err (!%p961_p4)
}
  0x2b   :  { %s965_s12 = scalar_lea.vmem %s23_s16, 32  ;;  %p970_p6 = scmp.lt.s32.totalorder %s23_s16, %s23_s16 }
  0x2c   :  { %p966_p5 = scmp.ne.s32.totalorder %s23_s16, %s965_s12  ;;  %p971_p7 = scmp.lt.s32.totalorder %s965_s12, %s965_s12 }
  0x2e   :  { %p972_p8 = por %p971_p7, %p970_p6 }
  0x30   :  { %p973_p9 = pnand %p972_p8, %p966_p5 }
  0x32   :  { %976 = shalt.err (!%p973_p9)
}
  0x33   :  { %25 = dma.hbm_to_vmem [thread:$0]  %s1284_s0, 32, %s23_s16, [#allocation3]  }
  0x34   :  { %s1056_s14 = smov [#allocation7]   ;;  %s1057_s17 = smov [#allocation10]  }
  0x35   :  { %s41_s15 = sshll.u32 %s1056_s14, 4  ;;  %s65_s18 = sshll.u32 %s1057_s17, 4  ;;  %s42_s15 = int_to_ptr.vmem [resolvable:$true] %s41_s15  ;;  %s66_s18 = int_to_ptr.vmem [resolvable:$true] %s65_s18 }
  0x36   :  { %s977_s21 = scalar_lea.hbm %s1286_s2, 512 }
  0x37   :  { %p978_p10 = scmp.ne.s32.totalorder %s1286_s2, %s977_s21  ;;  %p981_p11 = scmp.lt.u32.totalorder %s977_s21, %s1286_s2 }
  0x39   :  { %p983_p12 = pnand %p981_p11, %p978_p10 }
  0x3b   :  { %986 = shalt.err (!%p983_p12)
}
  0x3c   :  { %s987_s0 = scalar_lea.vmem %s42_s15, 512  ;;  %p992_p0 = scmp.lt.s32.totalorder %s42_s15, %s42_s15 }
  0x3d   :  { %p988_p13 = scmp.ne.s32.totalorder %s42_s15, %s987_s0  ;;  %p993_p1 = scmp.lt.s32.totalorder %s987_s0, %s987_s0 }
  0x3f   :  { %p994_p2 = por %p993_p1, %p992_p0 }
  0x41   :  { %p995_p3 = pnand %p994_p2, %p988_p13 }
  0x43   :  { %998 = shalt.err (!%p995_p3)
}
  0x44   :  { %47 = dma.hbm_to_vmem [thread:$0]  %s1286_s2, 512, %s42_s15, [#allocation6], %s1054_s24, %s1054_s24, %s1055_s25  }
  0x45   :  { %s999_s30 = scalar_lea.hbm %s1288_s4, 512 }
  0x46   :  { %p1000_p4 = scmp.ne.s32.totalorder %s1288_s4, %s999_s30  ;;  %p1003_p5 = scmp.lt.u32.totalorder %s999_s30, %s1288_s4 }
  0x48   :  { %p1005_p6 = pnand %p1003_p5, %p1000_p4 }
  0x4a   :  { %1008 = shalt.err (!%p1005_p6)
}
  0x4b   :  { %s1009_s12 = scalar_lea.vmem %s66_s18, 512  ;;  %p1014_p8 = scmp.lt.s32.totalorder %s66_s18, %s66_s18 }
  0x4c   :  { %p1010_p7 = scmp.ne.s32.totalorder %s66_s18, %s1009_s12  ;;  %p1015_p9 = scmp.lt.s32.totalorder %s1009_s12, %s1009_s12 }
  0x4e   :  { %p1016_p10 = por %p1015_p9, %p1014_p8 }
  0x50   :  { %p1017_p11 = pnand %p1016_p10, %p1010_p7 }
  0x52   :  { %1020 = shalt.err (!%p1017_p11)
}
  0x53   :  { %71 = dma.hbm_to_vmem [thread:$0]  %s1288_s4, 512, %s66_s18, [#allocation9], %s1054_s24, %s1054_s24, %s1055_s25  }
  0x54   :  { %1043 = dma.done.wait [#allocation3], 32  }
  0x55   :  { %1044 = vsyncadd [#allocation3], 4294967264 }
  0x56   :  { %1045 = dma.done.wait [#allocation6], 576  }
  0x57   :  { %1046 = vsyncadd [#allocation6], 4294966720 }
  0x58   :  { %1047 = dma.done.wait [#allocation9], 1024  }
  0x59   :  { %1048 = vsyncadd [#allocation9], 4294966272  ;;  %v93_v0 = vlaneseq  ;;  %v92_v4 = vld [vmem:[#allocation5] sm:$0x7]  ;;  %s1058_s13 = smov 64   ;;  %s1059_s4 = smov 32  }
  0x5a   :  { %v1186_v7 = vld [vmem:[#allocation2] sm:$0x3]  ;;  %v145_v12 = vld [vmem:[#allocation8] sm:$0xff]  ;;  %v146_v13 = vld [vmem:[#allocation8 + $0x8] sm:$0xff]  ;;  %s1060_s24 = smov 96   ;;  %v1061_v16 = vmov 0.0|0.0  }
  0x5b   :  { %v1174_v1 = vshrl.u32 %v93_v0, 7  ;;  %v147_v14 = vld [vmem:[#allocation8 + $0x10] sm:$0xff]  ;;  %855 = vmatprep.subr.bf16.mxu0 %v1061_v16  ;;  %v856_v17 = vpack.c.bf16 %v146_v13, %v145_v12  ;;  %v148_v18 = vld [vmem:[#allocation8 + $0x18] sm:$0xff]  ;;  %v141_v19 = vld [vmem:[#allocation7] sm:$0xff]  ;;  %vm1062_vm0 = vmmov 0   ;;  %v1063_v21 = vmov 0.0   ;;  %861 = vmatprep.subr.bf16.mxu1 %v1061_v16 }
  0x5c   :  { %v142_v20 = vld [vmem:[#allocation7 + $0x8] sm:$0xff]  ;;  %786 = vmatprep.mubr.msk.f32.mxu0 %vm1062_vm0, %v1063_v21  ;;  %v859_v23 = vpack.c.bf16 %v148_v18, %v147_v14  ;;  %797 = vmatprep.mubr.msk.f32.mxu1 %vm1062_vm0, %v1063_v21  ;;  %v143_v24 = vld [vmem:[#allocation7 + $0x10] sm:$0xff]  ;;  %v144_v25 = vld [vmem:[#allocation7 + $0x18] sm:$0xff]  ;;  %vm150_vm1 = vcmask 261120   ;;  %vm304_vm2 = vcmask 254976   ;;  %vm464_vm3 = vcmask 517376  }
  0x5d   :  { %v104_v2 = vsub.s32 1, %v1174_v1  ;;  %v95_v3 = vsub.s32 2, %v1174_v1  ;;  %v118_v9 = vsub.s32 0, %v1174_v1  ;;  %v1200_v22 = vpack.c.bf16 %v142_v20, %v141_v19  ;;  %857 = vmatpush3.bf16.msra.mxu0 %v856_v17  ;;  %v628_v38 = vld [vmem:[#allocation10] sm:$0xff]  ;;  %v629_v39 = vld [vmem:[#allocation10 + $0x8] sm:$0xff]  ;;  %v630_v42 = vld [vmem:[#allocation10 + $0x10] sm:$0xff] }
  0x5e   :  { %858 = vmatprep.subr.bf16.mxu0 %v1061_v16  ;;  %v1208_v26 = vpack.c.bf16 %v144_v25, %v143_v24  ;;  %v892_v41 = vpack.c.bf16 %v629_v39, %v628_v38  ;;  %v631_v43 = vld [vmem:[#allocation10 + $0x18] sm:$0xff]  ;;  %v149_v60 = vld [vmem:[%s1289_s5] sm:$0x7]  ;;  %s1064_s5 = smov [#allocation11]   ;;  %vm622_vm4 = vcmask 779776   ;;  %vm716_vm5 = vcmask 1042176  }
  0x5f   :  { %v1180_v5 = vrot.slane %v92_v4, %v104_v2  ;;  %v96_v6 = vrot.slane %v92_v4, %v95_v3  ;;  %v119_v15 = vrot.slane %v92_v4, %v118_v9  ;;  %863 = vmatpush3.bf16.msra.mxu1 %v1200_v22  ;;  %v895_v45 = vpack.c.bf16 %v631_v43, %v630_v42  ;;  %s724_s18 = sshll.u32 %s1064_s5, 4  ;;  %s725_s18 = int_to_ptr.vmem [resolvable:$true] %s724_s18 }
  0x60   :  { %864 = vmatprep.subr.bf16.mxu1 %v1061_v16  ;;  %v302_v61 = vrot.slane %v149_v60, %v118_v9  ;;  %v616_v12 = vrot.slane %v149_v60, %v95_v3  ;;  %p1026_p13 = scmp.lt.s32.totalorder %s725_s18, %s725_s18 }
  0x61   :  { %107 = vrot.lane.b32.xlu0 %v1180_v5, %s1058_s13  ;;  %v125_v8 = vmul.f32 %v96_v6, %v1186_v7  ;;  %860 = vmatpush3.bf16.msra.mxu0 %v859_v23  ;;  %v131_v51 = vmul.f32 %v1180_v5, %v1186_v7  ;;  %v458_v5 = vrot.slane %v149_v60, %v104_v2 }
  0x62   :  { %867 = vmatprep.subr.bf16.mxu0 %v1061_v16 }
  0x63   :  { %866 = vmatpush3.bf16.msra.mxu1 %v1208_v26 }
  0x64   :  { %873 = vmatprep.subr.bf16.mxu1 %v1061_v16  ;;  %787 = vmatmul.mubr.msk.f32.vlgmr.msra.gmra.mrb[0].mxu0 %vm150_vm1, %v1186_v7 }
  0x65   :  { %98 = vrot.lane.b32.xlu0 %v96_v6, %s1059_s4  ;;  %869 = vmatpush3.bf16.msra.mxu0 %v856_v17 }
  0x66   :  { %808 = vmatprep.mubr.msk.f32.mxu0 %vm1062_vm0, %v1063_v21  ;;  %870 = vmatprep.subr.bf16.mxu0 %v1061_v16 }
  0x69   :  { %127 = vrot.lane.b32.xlu0 %v125_v8, %s1058_s13  ;;  %872 = vmatpush3.bf16.msra.mxu0 %v859_v23 }
  0x6a   :  { %879 = vmatprep.subr.bf16.mxu0 %v1061_v16 }
  0xd3   :  { %v108_v10 = vpop.permute.xlu0 %107 }
  0xd4   :  { %v110_v11 = vmul.f32 %v108_v10, %v1186_v7 }
  0xd6   :  { %112 = vrot.lane.b32.xlu1 %v110_v11, %s1060_s24  ;;  %v741_v11 = vld [vmem:[%s1290_s6] ss:$0 sm:$0xff]  ;;  %s1021_s6 = scalar_lea.vmem %s725_s18, 32 }
  0xd7   :  { %v99_v27 = vpop.permute.xlu0 %98  ;;  %p1022_p12 = scmp.ne.s32.totalorder %s725_s18, %s1021_s6  ;;  %p1027_p0 = scmp.lt.s32.totalorder %s1021_s6, %s1021_s6 }
  0xd8   :  { %v101_v28 = vmul.f32 %v99_v27, %v1186_v7 }
  0xd9   :  { %p1028_p1 = por %p1027_p0, %p1026_p13 }
  0xda   :  { %121 = vrot.lane.b32.xlu1 %v119_v15, %s1058_s13 }
  0xdb   :  { %v128_v32 = vpop.permute.xlu0 %127  ;;  %p1029_p2 = pnand %p1028_p1, %p1022_p12 }
  0xde   :  { %132 = vrot.lane.b32.xlu1 %v119_v15, %s1059_s4 }
  0xe2   :  { %306 = vrot.lane.b32.xlu1 %v1186_v7, %s1060_s24 }
  0xe6   :  { %466 = vrot.lane.b32.xlu1 %v1186_v7, %s1058_s13 }
 0x137   :  { %v220_v47 = vpop.f32.mrb[0].mxu0 }
 0x138   :  { %v788_v48 = vpop.f32.mrb[1].mxu0 }
 0x148   :  { %v113_v29 = vpop.permute.xlu1 %112 }
 0x149   :  { %v115_v30 = vsub.f32 %v101_v28, %v113_v29 }
 0x14b   :  { %225 = vrot.lane.b32.xlu0 %v115_v30, %s1060_s24 }
 0x14c   :  { %v122_v31 = vpop.permute.xlu1 %121 }
 0x14d   :  { %v124_v33 = vmul.f32 %v122_v31, %v1186_v7 }
 0x14f   :  { %v130_v34 = vsub.f32 %v124_v33, %v128_v32 }
 0x150   :  { %v133_v35 = vpop.permute.xlu1 %132 }
 0x151   :  { %381 = vrot.lane.b32.xlu0 %v130_v34, %s1058_s13  ;;  %v135_v36 = vmul.f32 %v133_v35, %v1186_v7 }
 0x154   :  { %v307_v37 = vpop.permute.xlu1 %306 }
 0x155   :  { %137 = vrot.lane.b32.xlu0 %v135_v36, %s1060_s24  ;;  %809 = vmatmul.mubr.msk.f32.vlgmr.msra.gmra.mrb[2].mxu0 %vm150_vm1, %v307_v37  ;;  %v625_v44 = vadd.f32 %v307_v37, %v1186_v7 }
 0x156   :  { %881 = vmatpush3.bf16.msra.mxu0 %v856_v17  ;;  %830 = vmatprep.mubr.msk.f32.mxu0 %vm1062_vm0, %v1063_v21 }
 0x157   :  { %882 = vmatprep.subr.bf16.mxu0 %v1061_v16 }
 0x158   :  { %v467_v40 = vpop.permute.xlu1 %466 }
 0x159   :  { %v627_v46 = vadd.f32 %v625_v44, %v467_v40 }
 0x15a   :  { %884 = vmatpush3.bf16.msra.mxu0 %v859_v23 }
 0x15b   :  { %891 = vmatprep.subr.bf16.mxu0 %v1061_v16 }
 0x15d   :  { %831 = vmatmul.mubr.msk.f32.vlgmr.msra.gmra.mrb[4].mxu0 %vm150_vm1, %v467_v40 }
 0x15e   :  { %893 = vmatpush3.bf16.msra.mxu0 %v892_v41  ;;  %852 = vmatprep.mubr.msk.f32.mxu0 %vm1062_vm0, %v1063_v21 }
 0x15f   :  { %894 = vmatprep.subr.bf16.mxu0 %v1061_v16 }
 0x162   :  { %896 = vmatpush3.bf16.msra.mxu0 %v895_v45 }
 0x165   :  { %853 = vmatmul.mubr.msk.f32.vlgmr.msra.gmra.mrb[6].mxu0 %vm150_vm1, %v627_v46 }
 0x1bd   :  { %v226_v49 = vpop.permute.xlu0 %225 }
 0x1be   :  { %798 = vmatmul.mubr.msk.f32.vlgmr.msra.gmra.mrb[0].mxu1 %vm150_vm1, %v226_v49 }
 0x1bf   :  { %875 = vmatpush3.bf16.msra.mxu1 %v1200_v22  ;;  %819 = vmatprep.mubr.msk.f32.mxu1 %vm1062_vm0, %v1063_v21 }
 0x1c0   :  { %876 = vmatprep.subr.bf16.mxu1 %v1061_v16 }
 0x1c3   :  { %878 = vmatpush3.bf16.msra.mxu1 %v1208_v26  ;;  %v382_v50 = vpop.permute.xlu0 %381 }
 0x1c4   :  { %885 = vmatprep.subr.bf16.mxu1 %v1061_v16 }
 0x1c6   :  { %820 = vmatmul.mubr.msk.f32.vlgmr.msra.gmra.mrb[2].mxu1 %vm150_vm1, %v382_v50 }
 0x1c7   :  { %887 = vmatpush3.bf16.msra.mxu1 %v1200_v22  ;;  %v138_v52 = vpop.permute.xlu0 %137  ;;  %841 = vmatprep.mubr.msk.f32.mxu1 %vm1062_vm0, %v1063_v21 }
 0x1c8   :  { %888 = vmatprep.subr.bf16.mxu1 %v1061_v16  ;;  %v140_v53 = vsub.f32 %v131_v51, %v138_v52 }
 0x1cb   :  { %890 = vmatpush3.bf16.msra.mxu1 %v1208_v26 }
 0x1ce   :  { %842 = vmatmul.mubr.msk.f32.vlgmr.msra.gmra.mrb[4].mxu1 %vm150_vm1, %v140_v53 }
 0x228   :  { %v376_v54 = vpop.f32.mrb[2].mxu0 }
 0x229   :  { %v810_v55 = vpop.f32.mrb[3].mxu0 }
 0x230   :  { %v536_v56 = vpop.f32.mrb[4].mxu0 }
 0x231   :  { %v832_v57 = vpop.f32.mrb[5].mxu0 }
 0x238   :  { %v708_v58 = vpop.f32.mrb[6].mxu0 }
 0x239   :  { %v854_v59 = vpop.f32.mrb[7].mxu0  ;;  %v709_v9 = vadd.f32 %v741_v11, %v708_v58 }
 0x291   :  { %v295_v62 = vpop.f32.mrb[0].mxu1 }
 0x292   :  { %v296_v63 = vadd.f32 %v295_v62, %v220_v47  ;;  %v799_v0 = vpop.f32.mrb[1].mxu1 }
 0x294   :  { %v303_v4 = vadd.f32 %v302_v61, %v296_v63 }
 0x296   :  { %305 = vst.msk [vmem:[#allocation11] sm:$0x3] %vm304_vm2, %v303_v4 }
 0x299   :  { %v451_v6 = vpop.f32.mrb[2].mxu1 }
 0x29a   :  { %v452_v7 = vadd.f32 %v451_v6, %v376_v54  ;;  %v821_v8 = vpop.f32.mrb[3].mxu1 }
 0x29c   :  { %v459_v10 = vadd.f32 %v458_v5, %v452_v7 }
 0x29e   :  { %461 = vrot.lane.b32.xlu1 %v459_v10, %s1059_s4 }
 0x2a1   :  { %v609_v13 = vpop.f32.mrb[4].mxu1 }
 0x2a2   :  { %v610_v14 = vadd.f32 %v609_v13, %v536_v56  ;;  %713 = vrot.lane.b32.xlu1 %v709_v9, %s1060_s24  ;;  %v843_v15 = vpop.f32.mrb[5].mxu1 }
 0x2a4   :  { %v617_v2 = vadd.f32 %v616_v12, %v610_v14 }
 0x2a6   :  { %619 = vrot.lane.b32.xlu0 %v617_v2, %s1058_s13 }
 0x310   :  { %v462_v16 = vpop.permute.xlu1 %461 }
 0x311   :  { %465 = vst.msk [vmem:[#allocation11] sm:$0x3] %vm464_vm3, %v462_v16 }
 0x314   :  { %v714_v18 = vpop.permute.xlu1 %713 }
 0x318   :  { %v620_v17 = vpop.permute.xlu0 %619 }
 0x319   :  { %623 = vst.msk [vmem:[#allocation11] sm:$0x3] %vm622_vm4, %v620_v17 }
 0x31a   :  { %717 = vst.msk [vmem:[#allocation11] sm:$0x3] %vm716_vm5, %v714_v18 }
 0x31b   :  { %1032 = shalt.err (!%p1029_p2)
}
 0x31c   :  { %s1033_s21 = scalar_lea.hbm %s1291_s7, 32 }
 0x31d   :  { %p1034_p3 = scmp.ne.s32.totalorder %s1291_s7, %s1033_s21  ;;  %p1037_p4 = scmp.lt.u32.totalorder %s1033_s21, %s1291_s7 }
 0x31f   :  { %p1039_p5 = pnand %p1037_p4, %p1034_p3 }
 0x321   :  { %1042 = shalt.err (!%p1039_p5)
}
 0x322   :  { %727 = dma.vmem_to_hbm [thread:$0]  %s725_s18, 32, %s1291_s7, [#allocation4]  }
 0x323   :  { %1049 = dma.done.wait [#allocation4], 32  }
 0x324   :  { %1050 = vsyncadd [#allocation4], 4294967264 }
 0x325   :  { %731 = vsyncpa [#allocation3], 1 }
 0x326   :  { %732 = vsyncpa [#allocation6], 1 }
 0x327   :  { %733 = vsyncpa [#allocation9], 1 }
 0x328   :  { %734 = vsyncpa [#allocation4], 1 }

</bundles_post_ra>
